<compile_context>
chip_gen: v7x
topology: tpu7x:2x2x1
jax: 0.10.0
libtpu: 0.0.40
codegen_flags: <defaults>
</compile_context>

<pallas_src>
import functools

import jax
import jax.numpy as jnp
import numpy as np
from jax.experimental import pallas as pl
from jax.experimental.pallas import tpu as pltpu

_LANES = 128


def _round_up(n, m):
    return ((n + m - 1) // m) * m


def make_freq_bands(input_dim, output_dim):
    """Matches torch: 2.0 ** torch.linspace(0.0, 2*pi, steps=n_freqs) (float32)."""
    assert (output_dim - input_dim) % (input_dim * 2) == 0
    n_freqs = (output_dim - input_dim) // (input_dim * 2)
    lin = np.linspace(0.0, 2.0 * np.pi, n_freqs, dtype=np.float32)
    return (np.float32(2.0) ** lin).astype(np.float32)


def _fourier_kernel(x_ref, freq_ref, out_ref, *, input_dim, n_freqs):
    """(TB, D) tile -> (TB, D + 2*D*F) tile.

    Trig arguments are assembled in final output-lane order so cos/sin run
    once over a single (TB, 2*D*F) block and results land with two wide
    lane-slice stores (no output concatenate).
    """
    x = x_ref[...]                                   # (TB, D) float32
    tb = x.shape[0]
    two_f = 2 * n_freqs
    n_enc = input_dim * two_f

    # Lane-expand x so lane (2F*d + t) carries x[:, d]; one exact f32
    # elementwise multiply against the per-lane freq pattern then yields every
    # cos/sin argument already in its final lane position.
    xe = jnp.concatenate(
        [jnp.broadcast_to(x[:, d:d + 1], (tb, two_f)) for d in range(input_dim)],
        axis=1)                                      # (TB, 2*D*F)
    args = xe * freq_ref[...]                        # (1, 2*D*F) bcast over rows

    lane = jax.lax.broadcasted_iota(jnp.int32, (1, n_enc), 1)
    is_cos = (lane % two_f) < n_freqs                # [cos x F | sin x F] per d
    enc = jnp.where(is_cos, jnp.cos(args), jnp.sin(args))

    out_ref[:, :input_dim] = x.astype(out_ref.dtype)     # passthrough lanes
    out_ref[:, input_dim:] = enc.astype(out_ref.dtype)   # encoding lanes


def fourier_encoding(x, output_dim, *, block_rows=8192, out_dtype=jnp.float32,
                     multicore=True, vmem_budget_bytes=24 * 1024 * 1024):
    """x: (..., input_dim) -> (..., output_dim). Leading dims flattened/restored."""
    orig_shape = x.shape
    D = orig_shape[-1]
    assert (output_dim - D) % (D * 2) == 0
    F = (output_dim - D) // (D * 2)
    assert F >= 1, "output_dim must add at least one frequency band"

    # Per-output-lane multiplier, exact f32, passed as a real kernel INPUT
    # (Pallas forbids capturing array constants). Lane (2F*d + t) = freq[t % F].
    fb = make_freq_bands(D, output_dim)                        # (F,)
    freq_pattern = np.tile(fb, 2 * D).reshape(1, 2 * D * F)    # (1, 2*D*F) f32

    x2d = jnp.asarray(x, jnp.float32).reshape(-1, D)
    B = x2d.shape[0]

    # --- Batch tile sizing against an explicit, lane-padded VMEM budget. ---
    # Both blocks pad their last dim to 128 lanes in VMEM and each operand is
    # double-buffered, so the real footprint per TB row is:
    out_itemsize = jnp.dtype(out_dtype).itemsize
    bytes_per_row = 2 * (_round_up(D, _LANES) * 4
                         + _round_up(output_dim, _LANES) * out_itemsize)
    tb_vmem_cap = max(32, (vmem_budget_bytes // bytes_per_row) // 32 * 32)
    TB = max(32, min(block_rows, tb_vmem_cap, _round_up(B, 32)))
    grid = (pl.cdiv(B, TB),)            # ragged last block: no pad, no slice
    vmem_limit = int(min(48 * 1024 * 1024, TB * bytes_per_row + (4 << 20)))

    kernel = functools.partial(_fourier_kernel, input_dim=D, n_freqs=F)
    dim_sem = pltpu.CORE_PARALLEL if multicore else pltpu.PARALLEL

    out = pl.pallas_call(
        kernel,
        out_shape=jax.ShapeDtypeStruct((B, output_dim), out_dtype),
        grid=grid,
        in_specs=[
            pl.BlockSpec((TB, D), lambda i: (i, 0)),
            pl.BlockSpec((1, 2 * D * F), lambda i: (0, 0)),   # resident constant
        ],
        out_specs=pl.BlockSpec((TB, output_dim), lambda i: (i, 0)),
        compiler_params=pltpu.CompilerParams(
            dimension_semantics=(dim_sem,),
            vmem_limit_bytes=vmem_limit),
    )(x2d, jnp.asarray(freq_pattern))

    return out.reshape(*orig_shape[:-1], output_dim)


def ref_fourier_encoding(x, output_dim):
    """Pure-JAX reference mirroring the PyTorch forward."""
    D = x.shape[-1]
    freqs = jnp.asarray(make_freq_bands(D, output_dim))
    prod = x[..., None] * freqs                                     # (..., D, F)
    enc = jnp.concatenate([jnp.cos(prod), jnp.sin(prod)], axis=-1)  # (..., D, 2F)
    enc = enc.reshape(*enc.shape[:-2], -1)                          # (..., 2*D*F)
    return jnp.concatenate([x, enc], axis=-1)


if __name__ == "__main__":
    input_dim, n_freqs = 4, 4
    output_dim = input_dim + 2 * input_dim * n_freqs   # 36

    key = jax.random.PRNGKey(0)
    k1, k2 = jax.random.split(key)

    # Small: exercises leading-dim flattening + a single ragged block (B=21).
    x_small = jax.random.normal(k1, (3, 7, input_dim), dtype=jnp.float32)
    # Medium: with block_rows=256 exercises a multi-step grid with a ragged
    # last block (B=1200 -> grid=5, last block 176 rows), no padding anywhere.
    x_med = jax.random.normal(k2, (2, 600, input_dim), dtype=jnp.float32)

    cases = [
        (x_small, dict()),
        (x_med, dict(block_rows=256)),
        (x_med, dict()),                 # default sizing (single ragged tile)
    ]
    for xs, kwargs in cases:
        out = jax.block_until_ready(fourier_encoding(xs, output_dim, **kwargs))
        ref = jax.block_until_ready(ref_fourier_encoding(xs, output_dim))
        # cos/sin args reach ~2^(2*pi)*|x| (hundreds of radians); allow
        # ulp-of-argument differences between Mosaic and XLA transcendentals.
        np.testing.assert_allclose(np.asarray(out), np.asarray(ref),
                                   rtol=1e-5, atol=1e-4)
        assert out.shape == (*xs.shape[:-1], output_dim)

    # bf16 output knob (halves the dominant HBM write stream on v5e/v6e).
    out_bf16 = jax.block_until_ready(
        fourier_encoding(x_med, output_dim, out_dtype=jnp.bfloat16))
    ref_med = np.asarray(ref_fourier_encoding(x_med, output_dim))
    np.testing.assert_allclose(np.asarray(out_bf16.astype(jnp.float32)), ref_med,
                               rtol=2e-2, atol=2e-2)

    print("KERNEL_OK")
</pallas_src>

<mosaic_0001>
module attributes {stable_mosaic.version = 11 : i64} {
  func.func @_fourier_kernel(%arg0: i32, %arg1: memref<32x4xf32, #tpu.memory_space<vmem>>, %arg2: memref<1x32xf32, #tpu.memory_space<vmem>>, %arg3: memref<32x36xf32, #tpu.memory_space<vmem>>) attributes {dimension_semantics = [#tpu.dimension_semantics<core_parallel>], iteration_bounds = array<i64: 1>, scalar_prefetch = 0 : i64, scratch_operands = 0 : i64, tpu.core_type = #tpu.core_type<tc>, window_params = [{transform_indices = @transform_0, window_bounds = array<i64: 32, 4>}, {pipeline_mode = #tpu.pipeline_mode<synchronous>, transform_indices = @transform_1, window_bounds = array<i64: 1, 32>}, {transform_indices = @transform_2, window_bounds = array<i64: 32, 36>}]} {
    %c0 = arith.constant 0 : index
    %c0_0 = arith.constant 0 : index
    %0 = vector.load %arg1[%c0, %c0_0] : memref<32x4xf32, #tpu.memory_space<vmem>>, vector<32x4xf32>
    %1 = vector.extract_strided_slice %0 {offsets = [0, 0], sizes = [32, 1], strides = [1, 1]} : vector<32x4xf32> to vector<32x1xf32>
    %2 = vector.shape_cast %1 : vector<32x1xf32> to vector<32x1xf32>
    %3 = vector.broadcast %2 : vector<32x1xf32> to vector<32x8xf32>
    %4 = vector.extract_strided_slice %0 {offsets = [0, 1], sizes = [32, 1], strides = [1, 1]} : vector<32x4xf32> to vector<32x1xf32>
    %5 = vector.shape_cast %4 : vector<32x1xf32> to vector<32x1xf32>
    %6 = vector.broadcast %5 : vector<32x1xf32> to vector<32x8xf32>
    %7 = vector.extract_strided_slice %0 {offsets = [0, 2], sizes = [32, 1], strides = [1, 1]} : vector<32x4xf32> to vector<32x1xf32>
    %8 = vector.shape_cast %7 : vector<32x1xf32> to vector<32x1xf32>
    %9 = vector.broadcast %8 : vector<32x1xf32> to vector<32x8xf32>
    %10 = vector.extract_strided_slice %0 {offsets = [0, 3], sizes = [32, 1], strides = [1, 1]} : vector<32x4xf32> to vector<32x1xf32>
    %11 = vector.shape_cast %10 : vector<32x1xf32> to vector<32x1xf32>
    %12 = vector.broadcast %11 : vector<32x1xf32> to vector<32x8xf32>
    %13 = tpu.concatenate %3, %6, %9, %12 in 1 : vector<32x8xf32>, vector<32x8xf32>, vector<32x8xf32>, vector<32x8xf32> -> vector<32x32xf32>
    %c0_1 = arith.constant 0 : index
    %c0_2 = arith.constant 0 : index
    %14 = vector.load %arg2[%c0_1, %c0_2] : memref<1x32xf32, #tpu.memory_space<vmem>>, vector<1x32xf32>
    %15 = vector.broadcast %14 : vector<1x32xf32> to vector<32x32xf32>
    %16 = arith.mulf %13, %15 : vector<32x32xf32>
    %17 = tpu.iota {dimensions = array<i32: 1>} : vector<1x32xi32>
    %c8_i32 = arith.constant 8 : i32
    %c0_i32 = arith.constant 0 : i32
    %18 = arith.cmpi eq, %c8_i32, %c0_i32 : i32
    %c1_i32 = arith.constant 1 : i32
    %19 = arith.select %18, %c1_i32, %c8_i32 : i32
    %20 = vector.broadcast %19 : i32 to vector<1x32xi32>
    %21 = arith.remsi %17, %20 : vector<1x32xi32>
    %c0_i32_3 = arith.constant 0 : i32
    %22 = vector.broadcast %c0_i32_3 : i32 to vector<1x32xi32>
    %23 = arith.cmpi ne, %21, %22 : vector<1x32xi32>
    %c0_i32_4 = arith.constant 0 : i32
    %24 = vector.broadcast %c0_i32_4 : i32 to vector<1x32xi32>
    %25 = arith.cmpi slt, %21, %24 : vector<1x32xi32>
    %c0_i32_5 = arith.constant 0 : i32
    %26 = arith.cmpi slt, %19, %c0_i32_5 : i32
    %27 = vector.broadcast %26 : i1 to vector<1x32xi1>
    %28 = vector.broadcast %27 : vector<1x32xi1> to vector<1x32xi1>
    %29 = arith.xori %25, %28 : vector<1x32xi1>
    %30 = arith.andi %29, %23 : vector<1x32xi1>
    %31 = vector.broadcast %19 : i32 to vector<1x32xi32>
    %32 = arith.addi %21, %31 : vector<1x32xi32>
    %33 = arith.select %30, %32, %21 : vector<1x32xi1>, vector<1x32xi32>
    %c4_i32 = arith.constant 4 : i32
    %34 = vector.broadcast %c4_i32 : i32 to vector<1x32xi32>
    %35 = arith.cmpi slt, %33, %34 : vector<1x32xi32>
    %36 = math.cos %16 : vector<32x32xf32>
    %37 = math.sin %16 : vector<32x32xf32>
    %38 = vector.shape_cast %35 : vector<1x32xi1> to vector<1x32xi1>
    %39 = vector.broadcast %38 : vector<1x32xi1> to vector<32x32xi1>
    %40 = arith.select %39, %36, %37 : vector<32x32xi1>, vector<32x32xf32>
    %c0_6 = arith.constant 0 : index
    %c0_7 = arith.constant 0 : index
    %41 = vector.load %arg3[%c0_6, %c0_7] : memref<32x36xf32, #tpu.memory_space<vmem>>, vector<32x4xf32>
    tpu.vector_store %arg3[%c0_6, %c0_7], %0 {strides = array<i32>} : memref<32x36xf32, #tpu.memory_space<vmem>>, vector<32x4xf32>,
    %c0_8 = arith.constant 0 : index
    %c4 = arith.constant 4 : index
    %42 = vector.load %arg3[%c0_8, %c4] : memref<32x36xf32, #tpu.memory_space<vmem>>, vector<32x32xf32>
    tpu.vector_store %arg3[%c0_8, %c4], %40 {strides = array<i32>} : memref<32x36xf32, #tpu.memory_space<vmem>>, vector<32x32xf32>,
    return
  }
  func.func @transform_0(%arg0: i32) -> (i32, i32) {
    %c0_i32 = arith.constant 0 : i32
    %c0_i32_0 = arith.constant 0 : i32
    return %arg0, %c0_i32 : i32, i32
  }
  func.func @transform_1(%arg0: i32) -> (i32, i32) {
    %c0_i32 = arith.constant 0 : i32
    %c0_i32_0 = arith.constant 0 : i32
    %c0_i32_1 = arith.constant 0 : i32
    return %c0_i32, %c0_i32_0 : i32, i32
  }
  func.func @transform_2(%arg0: i32) -> (i32, i32) {
    %c0_i32 = arith.constant 0 : i32
    %c0_i32_0 = arith.constant 0 : i32
    return %arg0, %c0_i32 : i32, i32
  }
}

</mosaic_0001>

<bundles_post_ra>
// kernel: tpu_custom_call.1
= control target key start
LH: loop header
LB: loop body
LE: loop exit
PB: predicated region body
PF: predicated region fallthrough
CT: control target
= control target key end

     0   :  { %s1201_s9 = sld [smem:[#allocation0]]   ;;  %s1590_s0 = inlined_call_operand.vmem [shape: f32[21,4], index: 0, kind: input, shape index: {}]   ;;  %s1591_s1 = inlined_call_operand.vmem [shape: f32[1,32], index: 1, kind: input, shape index: {}]   ;;  %s1592_s2 = inlined_call_operand.hbm [shape: f32[21,36], index: 2, kind: output, shape index: {}]  }
   0x1   :  { %v1172_v0 = vmov 0  }
   0x2   :  { %1119 = vset.pattern.permute.xlu1 %v1172_v0  ;;  %1118 = vset.pattern.permute.xlu0 %v1172_v0 }
   0x6   :  { %s1046_s10 = sshll.u32 %s1201_s9, 2 }
   0x7   :  { %p32_p0 = scmp.lt.s32.totalorder %s1046_s10, 2  ;;  %s1018_s11 = ssub.s32 3, %s1046_s10 }
   0x8   :  { %7 = vsyncpa [#allocation3], 0  ;;  %s1204_s12 = sshll.u32 %s1018_s11, 7  ;;  %v1173_v5 = vmov 1   ;;  %v1174_v6 = vmov 2   ;;  %v1175_v7 = vmov 3  }
   0x9   :  { %s1602_s10 = smov (!%p32_p0, %s1046_s10), 2  ;;  %s1021_s13 = ssub.s32 512, %s1204_s12  ;;  %vm114_vm0 = vcmask 64512   ;;  %vm119_vm1 = vcmask 130048   ;;  %vm124_vm2 = vcmask 195584  }
   0xa   :  { %s1047_s14 = sshll.u32 %s1602_s10, 3  ;;  %v1238_v20 = vld [vmem:[%s1591_s1] ss:$0 sm:$0xff]  ;;  %v1176_v61 = vmov 683565275   ;;  %s1182_s1 = smov 4  }
   0xb   :  { %s35_s17 = scalar_lea.vmem %s1590_s0, %s1047_s14  ;;  %v1177_v63 = vmov 2475754826  }
   0xc   :  { %v1210_v1 = vld [vmem:[%s35_s17 + $0x10] sm:$0xff]  ;;  %v1212_v2 = vld [vmem:[%s35_s17] sm:$0xff]  ;;  %v1216_v3 = vld [vmem:[%s35_s17 + $0x18] sm:$0xff] }
   0xd   :  { %58 = vperm.xlu1 %1119, %v1210_v1   ;;  %48 = vperm.xlu0 %1118, %v1212_v2   ;;  %v1218_v4 = vld [vmem:[%s35_s17 + $0x8] sm:$0xff] }
  0x11   :  { %63 = vperm.xlu1 %1119, %v1216_v3   ;;  %53 = vperm.xlu0 %1118, %v1218_v4  }
  0x15   :  { %1121 = vset.pattern.permute.xlu1 %v1173_v5  ;;  %1120 = vset.pattern.permute.xlu0 %v1173_v5 }
  0x16   :  { %71 = vperm.xlu1 %1121, %v1218_v4   ;;  %67 = vperm.xlu0 %1120, %v1212_v2  }
  0x1a   :  { %75 = vperm.xlu1 %1121, %v1210_v1   ;;  %79 = vperm.xlu0 %1120, %v1216_v3  }
  0x1e   :  { %1122 = vset.pattern.permute.xlu1 %v1174_v6  ;;  %1123 = vset.pattern.permute.xlu0 %v1174_v6  ;;  %v1178_v6 = vmov 2131351028  }
  0x1f   :  { %83 = vperm.xlu1 %1122, %v1212_v2   ;;  %87 = vperm.xlu0 %1123, %v1218_v4  }
  0x23   :  { %91 = vperm.xlu1 %1122, %v1210_v1   ;;  %1124 = vset.pattern.permute.xlu0 %v1175_v7 }
  0x24   :  { %99 = vperm.xlu0 %1124, %v1212_v2  }
  0x27   :  { %95 = vperm.xlu1 %1122, %v1216_v3  }
  0x28   :  { %111 = vperm.xlu0 %1124, %v1216_v3  }
  0x2b   :  { %1125 = vset.pattern.permute.xlu1 %v1175_v7 }
  0x2c   :  { %103 = vperm.xlu1 %1125, %v1218_v4  }
  0x30   :  { %107 = vperm.xlu1 %1125, %v1210_v1  }
  0x8c   :  { %v59_v8 = vpop.permute.xlu1 %58  ;;  %v49_v9 = vpop.permute.xlu0 %48 }
  0x90   :  { %v64_v10 = vpop.permute.xlu1 %63  ;;  %v54_v11 = vpop.permute.xlu0 %53 }
  0x95   :  { %v72_v12 = vpop.permute.xlu1 %71  ;;  %v68_v13 = vpop.permute.xlu0 %67 }
  0x96   :  { %v115_v18 = vsel %vm114_vm0, %v49_v9, %v68_v13  ;;  %v116_v35 = vsel %vm114_vm0, %v54_v11, %v72_v12 }
  0x99   :  { %v76_v14 = vpop.permute.xlu1 %75  ;;  %v80_v15 = vpop.permute.xlu0 %79 }
  0x9a   :  { %v118_v25 = vsel %vm114_vm0, %v64_v10, %v80_v15  ;;  %v117_v48 = vsel %vm114_vm0, %v59_v8, %v76_v14  ;;  %v1179_v8 = vmov 2102212464   ;;  %v1180_v10 = vmov 920167782  }
  0x9e   :  { %v84_v16 = vpop.permute.xlu1 %83  ;;  %v88_v17 = vpop.permute.xlu0 %87 }
  0x9f   :  { %v120_v21 = vsel %vm119_vm1, %v115_v18, %v84_v16  ;;  %v121_v36 = vsel %vm119_vm1, %v116_v35, %v88_v17  ;;  %v1181_v17 = vmov 1326507024  }
  0xa2   :  { %v92_v19 = vpop.permute.xlu1 %91 }
  0xa3   :  { %v100_v22 = vpop.permute.xlu0 %99  ;;  %v122_v52 = vsel %vm119_vm1, %v117_v48, %v92_v19 }
  0xa4   :  { %v125_v23 = vsel %vm124_vm2, %v120_v21, %v100_v22 }
  0xa5   :  { %v1243_v24 = vmul.f32 %v1238_v20, %v125_v23 }
  0xa6   :  { %v96_v26 = vpop.permute.xlu1 %95 }
  0xa7   :  { %v155_v27 = vand.u32 2147483647, %v1243_v24  ;;  %v158_v28 = vand.u32 2139095040, %v1243_v24  ;;  %v123_v29 = vsel %vm119_vm1, %v118_v25, %v96_v26  ;;  %v112_v30 = vpop.permute.xlu0 %111 }
  0xa8   :  { %v128_v31 = vsel %vm124_vm2, %v123_v29, %v112_v30 }
  0xa9   :  { %v159_v32 = vshrl.u32 %v158_v28, 23  ;;  %v162_v33 = vand.u32 8388607, %v155_v27  ;;  %v1253_v34 = vmul.f32 %v1238_v20, %v128_v31 }
  0xab   :  { %v1049_v37 = vadd.s32 4294967169, %v159_v32  ;;  %v464_v38 = vand.u32 2147483647, %v1253_v34  ;;  %v104_v39 = vpop.permute.xlu1 %103  ;;  %v467_v40 = vand.u32 2139095040, %v1253_v34  ;;  %v163_v42 = vor.u32 8388608, %v162_v33 }
  0xac   :  { %v126_v41 = vsel %vm124_vm2, %v121_v36, %v104_v39 }
  0xad   :  { %v165_v43 = vadd.s32 1, %v1049_v37  ;;  %v1261_v44 = vmul.f32 %v1238_v20, %v126_v41  ;;  %v468_v45 = vshrl.u32 %v467_v40, 23  ;;  %v471_v46 = vand.u32 8388607, %v464_v38 }
  0xae   :  { %v1268_v55 = vshll.u32 %v163_v42, 8 }
  0xaf   :  { %vm166_vm3 = vcmp.gt.s32.totalorder %v165_v43, 0  ;;  %v108_v47 = vpop.permute.xlu1 %107  ;;  %v1061_v50 = vadd.s32 4294967169, %v468_v45  ;;  %v261_v51 = vand.u32 2139095040, %v1261_v44  ;;  %v472_v56 = vor.u32 8388608, %v471_v46 }
  0xb0   :  { %v167_v49 = vsel %vm166_vm3, %v165_v43, 0  ;;  %v258_v58 = vand.u32 2147483647, %v1261_v44  ;;  %v1272_v59 = vsel %vm124_vm2, %v122_v52, %v108_v47 }
  0xb1   :  { %v168_v53 = vshrl.u32 %v167_v49, 5  ;;  %v169_v54 = vand.u32 31, %v167_v49  ;;  %v474_v57 = vadd.s32 1, %v1061_v50  ;;  %v262_v5 = vshrl.u32 %v261_v51, 23 }
  0xb2   :  { %v1294_v45 = vshll.u32 %v472_v56, 8  ;;  %v1298_v46 = vand.u32 8388607, %v258_v58 }
  0xb3   :  { %v170_v60 = vsub.s32 32, %v169_v54  ;;  %v172_v62 = vshll.u32 %v1176_v61, %v169_v54  ;;  %v175_v0 = vshll.u32 %v1177_v63, %v169_v54  ;;  %v178_v7 = vshll.u32 %v1178_v6, %v169_v54 }
  0xb4   :  { %v181_v9 = vshll.u32 %v1179_v8, %v169_v54  ;;  %v184_v11 = vshll.u32 %v1180_v10, %v169_v54  ;;  %vm187_vm4 = vcmp.lt.s32.totalorder %v168_v53, 1  ;;  %vm188_vm5 = vcmp.lt.s32.totalorder %v168_v53, 2 }
  0xb5   :  { %v173_v12 = vshrl.u32 %v1177_v63, %v170_v60  ;;  %v176_v13 = vshrl.u32 %v1178_v6, %v170_v60  ;;  %v179_v14 = vshrl.u32 %v1179_v8, %v170_v60  ;;  %v171_v15 = vshrl.u32 %v1176_v61, %v170_v60 }
  0xb6   :  { %v182_v16 = vshrl.u32 %v1180_v10, %v170_v60  ;;  %v185_v18 = vshrl.u32 %v1181_v17, %v170_v60  ;;  %vm189_vm6 = vcmp.lt.s32.totalorder %v168_v53, 3  ;;  %vm475_vm7 = vcmp.gt.s32.totalorder %v474_v57, 0 }
  0xb7   :  { %v174_v19 = vor.u32 %v173_v12, %v172_v62  ;;  %v177_v21 = vor.u32 %v176_v13, %v175_v0  ;;  %v180_v22 = vor.u32 %v179_v14, %v178_v7  ;;  %vm190_vm8 = vcmp.lt.s32.totalorder %v168_v53, 4 }
  0xb8   :  { %v183_v23 = vor.u32 %v182_v16, %v181_v9  ;;  %v186_v25 = vor.u32 %v185_v18, %v184_v11  ;;  %v476_v26 = vsel %vm475_vm7, %v474_v57, 0  ;;  %v1053_v53 = vadd.s32 4294967169, %v262_v5 }
  0xb9   :  { %v191_v28 = vsel %vm187_vm4, %v171_v15, %v174_v19  ;;  %v192_v29 = vsel %vm190_vm8, %v180_v22, 2102212464  ;;  %v195_v30 = vsel %vm187_vm4, %v174_v19, %v177_v21  ;;  %v199_v31 = vsel %vm187_vm4, %v177_v21, %v180_v22 }
  0xba   :  { %v193_v32 = vsel %vm189_vm6, %v177_v21, %v192_v29  ;;  %v196_v33 = vsel %vm190_vm8, %v183_v23, 920167782  ;;  %v200_v35 = vsel %vm190_vm8, %v186_v25, 1326507024  ;;  %v477_v36 = vshrl.u32 %v476_v26, 5 }
  0xbb   :  { %v194_v37 = vsel %vm188_vm5, %v191_v28, %v193_v32  ;;  %v197_v39 = vsel %vm189_vm6, %v180_v22, %v196_v33  ;;  %v201_v40 = vsel %vm189_vm6, %v183_v23, %v200_v35  ;;  %v478_v41 = vand.u32 31, %v476_v26 }
  0xbc   :  { %v198_v42 = vsel %vm188_vm5, %v195_v30, %v197_v39  ;;  %v202_v43 = vsel %vm188_vm5, %v199_v31, %v201_v40  ;;  %v210_v51 = vmul.u32 %v1268_v55, %v194_v37  ;;  %vm496_vm9 = vcmp.lt.s32.totalorder %v477_v36, 1 }
  0xbd   :  { %v1301_v47 = vmul.u32.u64.low %v1268_v55, %v202_v43  ;;  %v1302_v48 = vmul.u32.u64.high %v1268_v55, %v202_v43, %v1301_v47  ;;  %v1305_v49 = vmul.u32.u64.low %v1268_v55, %v198_v42  ;;  %v1306_v50 = vmul.u32.u64.high %v1268_v55, %v198_v42, %v1305_v49 }
  0xbe   :  { %v479_v52 = vsub.s32 32, %v478_v41  ;;  %v481_v54 = vshll.u32 %v1176_v61, %v478_v41  ;;  %v484_v56 = vshll.u32 %v1177_v63, %v478_v41  ;;  %v487_v57 = vshll.u32 %v1178_v6, %v478_v41 }
  0xbf   :  { %v490_v60 = vshll.u32 %v1179_v8, %v478_v41  ;;  %v493_v9 = vshll.u32 %v1180_v10, %v478_v41  ;;  %vm212_vm10 = vc.u32 %v1302_v48, %v1305_v49  ;;  %v213_v55 = vadd.s32 1, %v1306_v50 }
  0xc0   :  { %v482_v62 = vshrl.u32 %v1177_v63, %v479_v52  ;;  %v485_v0 = vshrl.u32 %v1178_v6, %v479_v52  ;;  %v488_v7 = vshrl.u32 %v1179_v8, %v479_v52  ;;  %v491_v5 = vshrl.u32 %v1180_v10, %v479_v52 }
  0xc1   :  { %vm497_vm11 = vcmp.lt.s32.totalorder %v477_v36, 2  ;;  %v494_v14 = vshrl.u32 %v1181_v17, %v479_v52  ;;  %v214_v15 = vsel %vm212_vm10, %v213_v55, %v1306_v50  ;;  %v480_v16 = vshrl.u32 %v1176_v61, %v479_v52 }
  0xc2   :  { %v483_v11 = vor.u32 %v482_v62, %v481_v54  ;;  %v486_v12 = vor.u32 %v485_v0, %v484_v56  ;;  %v489_v13 = vor.u32 %v488_v7, %v487_v57  ;;  %v492_v18 = vor.u32 %v491_v5, %v490_v60 }
  0xc3   :  { %vm499_vm12 = vcmp.lt.s32.totalorder %v477_v36, 4  ;;  %v215_v19 = vadd.s32 %v214_v15, %v210_v51  ;;  %v495_v21 = vor.u32 %v494_v14, %v493_v9  ;;  %vm498_vm13 = vcmp.lt.s32.totalorder %v477_v36, 3 }
  0xc4   :  { %v501_v22 = vsel %vm499_vm12, %v489_v13, 2102212464  ;;  %v500_v23 = vsel %vm496_vm9, %v480_v16, %v483_v11  ;;  %v504_v25 = vsel %vm496_vm9, %v483_v11, %v486_v12  ;;  %v505_v26 = vsel %vm499_vm12, %v492_v18, 920167782 }
  0xc5   :  { %v508_v28 = vsel %vm496_vm9, %v486_v12, %v489_v13  ;;  %v216_v29 = vadd.s32 536870912, %v215_v19  ;;  %v502_v30 = vsel %vm498_vm13, %v486_v12, %v501_v22  ;;  %v506_v31 = vsel %vm498_vm13, %v489_v13, %v505_v26 }
  0xc6   :  { %v509_v32 = vsel %vm499_vm12, %v495_v21, 1326507024  ;;  %v507_v33 = vsel %vm497_vm11, %v504_v25, %v506_v31  ;;  %v266_v37 = vor.u32 8388608, %v1298_v46  ;;  %v268_v39 = vadd.s32 1, %v1053_v53 }
  0xc7   :  { %v510_v35 = vsel %vm498_vm13, %v492_v18, %v509_v32  ;;  %v1328_v40 = vshrl.u32 %v216_v29, 30  ;;  %v1332_v42 = vmul.u32.u64.low %v1294_v45, %v507_v33  ;;  %v1333_v43 = vmul.u32.u64.high %v1294_v45, %v507_v33, %v1332_v42 }
  0xc8   :  { %v511_v41 = vsel %vm497_vm11, %v508_v28, %v510_v35  ;;  %v503_v47 = vsel %vm497_vm11, %v500_v23, %v502_v30  ;;  %vm269_vm14 = vcmp.gt.s32.totalorder %v268_v39, 0  ;;  %v1344_v54 = vmul.f32 %v1238_v20, %v1272_v59 }
  0xc9   :  { %v1338_v50 = vmul.u32.u64.low %v1294_v45, %v511_v41  ;;  %v1339_v51 = vmul.u32.u64.high %v1294_v45, %v511_v41, %v1338_v50  ;;  %v218_v52 = vshll.u32 %v1328_v40, 30  ;;  %v270_v46 = vsel %vm269_vm14, %v268_v39, 0 }
  0xca   :  { %v272_v53 = vand.u32 31, %v270_v46  ;;  %v140_v56 = vlaneseq  ;;  %v211_v57 = vadd.s32 %v1305_v49, %v1302_v48  ;;  %v519_v36 = vmul.u32 %v1294_v45, %v503_v47 }
  0xcb   :  { %v1347_v60 = vsub.s32 %v215_v19, %v218_v52  ;;  %v522_v62 = vadd.s32 1, %v1333_v43  ;;  %vm521_vm15 = vc.u32 %v1339_v51, %v1332_v42  ;;  %v271_v0 = vshrl.u32 %v270_v46, 5 }
  0xcc   :  { %v273_v7 = vsub.s32 32, %v272_v53  ;;  %v1353_v9 = vshll.u32 %v266_v37, 8  ;;  %v275_v59 = vshll.u32 %v1176_v61, %v272_v53  ;;  %v278_v48 = vshll.u32 %v1177_v63, %v272_v53 }
  0xcd   :  { %v221_v55 = vsub.s32 0, %v1347_v60  ;;  %v523_v20 = vsel %vm521_vm15, %v522_v62, %v1333_v43  ;;  %v281_v11 = vshll.u32 %v1178_v6, %v272_v53  ;;  %v284_v14 = vshll.u32 %v1179_v8, %v272_v53 }
  0xce   :  { %v524_v49 = vadd.s32 %v523_v20, %v519_v36  ;;  %v276_v45 = vshrl.u32 %v1177_v63, %v273_v7  ;;  %v279_v5 = vshrl.u32 %v1178_v6, %v273_v7  ;;  %v282_v13 = vshrl.u32 %v1179_v8, %v273_v7 }
  0xcf   :  { %v1050_v12 = vmin.u32 %v221_v55, %v1347_v60  ;;  %v285_v15 = vshrl.u32 %v1180_v10, %v273_v7  ;;  %v287_v21 = vshll.u32 %v1180_v10, %v272_v53  ;;  %v288_v26 = vshrl.u32 %v1181_v17, %v273_v7 }
  0xd0   :  { %v525_v16 = vadd.s32 536870912, %v524_v49  ;;  %v277_v18 = vor.u32 %v276_v45, %v275_v59  ;;  %v280_v19 = vor.u32 %v279_v5, %v278_v48  ;;  %v283_v23 = vor.u32 %v282_v13, %v281_v11 }
  0xd1   :  { %v223_v22 = vclz %v1050_v12  ;;  %v286_v25 = vor.u32 %v285_v15, %v284_v14  ;;  %v274_v29 = vshrl.u32 %v1176_v61, %v273_v7  ;;  %vm290_vm0 = vcmp.lt.s32.totalorder %v271_v0, 1 }
  0xd2   :  { %v1368_v28 = vshrl.u32 %v525_v16, 30  ;;  %v364_v30 = vand.u32 2139095040, %v1344_v54  ;;  %v289_v32 = vor.u32 %v288_v26, %v287_v21  ;;  %vm292_vm1 = vcmp.lt.s32.totalorder %v271_v0, 3 }
  0xd3   :  { %v1051_v31 = vadd.s32 4294967294, %v223_v22  ;;  %vm293_vm2 = vcmp.lt.s32.totalorder %v271_v0, 4  ;;  %v298_v37 = vsel %vm290_vm0, %v277_v18, %v280_v19  ;;  %vm291_vm4 = vcmp.lt.s32.totalorder %v271_v0, 2 }
  0xd4   :  { %v527_v33 = vshll.u32 %v1368_v28, 30  ;;  %v295_v35 = vsel %vm293_vm2, %v283_v23, 2102212464  ;;  %v299_v39 = vsel %vm293_vm2, %v286_v25, 920167782  ;;  %v294_v41 = vsel %vm290_vm0, %v274_v29, %v277_v18 }
  0xd5   :  { %vm1052_vm3 = vcmp.lt.s32.totalorder %v1051_v31, 0  ;;  %v300_v43 = vsel %vm292_vm1, %v283_v23, %v299_v39  ;;  %v302_v46 = vsel %vm290_vm0, %v280_v19, %v283_v23  ;;  %v296_v62 = vsel %vm292_vm1, %v280_v19, %v295_v35 }
  0xd6   :  { %v226_v47 = vsel %vm1052_vm3, 0, %v1051_v31  ;;  %v1378_v50 = vsub.s32 %v524_v49, %v527_v33  ;;  %v301_v52 = vsel %vm291_vm4, %v298_v37, %v300_v43  ;;  %v303_v7 = vsel %vm293_vm2, %v289_v32, 1326507024 }
  0xd7   :  { %v227_v53 = vsub.s32 32, %v226_v47  ;;  %v231_v36 = vsub.s32 4294967266, %v226_v47  ;;  %v304_v20 = vsel %vm292_vm1, %v286_v25, %v303_v7  ;;  %v228_v49 = vshll.u32 %v1347_v60, %v226_v47 }
  0xd8   :  { %v530_v55 = vsub.s32 0, %v1378_v50  ;;  %v1387_v59 = vmul.u32.u64.low %v1353_v9, %v301_v52  ;;  %v1388_v48 = vmul.u32.u64.high %v1353_v9, %v301_v52, %v1387_v59  ;;  %v305_v11 = vsel %vm291_vm4, %v302_v46, %v304_v20 }
  0xd9   :  { %v229_v45 = vshrl.u32 %v211_v57, %v227_v53  ;;  %v232_v5 = vadd.s32 127, %v231_v36  ;;  %v1395_v13 = vmul.u32.u64.low %v1353_v9, %v305_v11  ;;  %v1396_v14 = vmul.u32.u64.high %v1353_v9, %v305_v11, %v1395_v13 }
  0xda   :  { %v1062_v12 = vmin.u32 %v530_v55, %v1378_v50  ;;  %v365_v15 = vshrl.u32 %v364_v30, 23  ;;  %v297_v19 = vsel %vm291_vm4, %v294_v41, %v296_v62  ;;  %v361_v21 = vand.u32 2147483647, %v1344_v54 }
  0xdb   :  { %v230_v16 = vor.u32 %v229_v45, %v228_v49  ;;  %v233_v18 = vshll.u32 %v232_v5, 23  ;;  %v316_v60 = vadd.s32 1, %v1388_v48  ;;  %v241_v23 = vsub.s32 4, %v1328_v40 }
  0xdc   :  { %v532_v22 = vclz %v1062_v12  ;;  %v1057_v57 = vadd.s32 4294967169, %v365_v15  ;;  %vm157_vm5 = vcmp.lt.s32.totalorder %v1243_v24, 0  ;;  %v1404_v26 = vand.u32 127, %v140_v56 }
  0xdd   :  { %v234_v25 = vor.u32 4788187, %v233_v18  ;;  %v313_v30 = vmul.u32 %v1353_v9, %v297_v19  ;;  %vm315_vm6 = vc.u32 %v1396_v14, %v1387_v59  ;;  %v237_v32 = vcvt.s32.f32 %v230_v16 }
  0xde   :  { %v1063_v29 = vadd.s32 4294967294, %v532_v22  ;;  %v371_v0 = vadd.s32 1, %v1057_v57  ;;  %v317_v33 = vsel %vm315_vm6, %v316_v60, %v1388_v48  ;;  %v1412_v35 = vand.u32 8388607, %v361_v21 }
  0xdf   :  { %v235_v31 = vand.u32 2147483647, %v234_v25  ;;  %v318_v37 = vadd.s32 %v317_v33, %v313_v30  ;;  %v242_v56 = vsel %vm157_vm5, %v241_v23, %v1328_v40  ;;  %vm1419_vm9 = vcmp.le.f32.partialorder %v155_v27, 0.7853982 }
  0xe0   :  { %vm1064_vm7 = vcmp.lt.s32.totalorder %v1063_v29, 0  ;;  %vm372_vm8 = vcmp.gt.s32.totalorder %v371_v0, 0  ;;  %v520_v47 = vadd.s32 %v1332_v42, %v1339_v51  ;;  %v369_v62 = vor.u32 8388608, %v1412_v35 }
  0xe1   :  { %v238_v9 = vmul.f32 %v237_v32, %v235_v31  ;;  %v535_v39 = vsel %vm1064_vm7, 0, %v1063_v29  ;;  %v373_v41 = vsel %vm372_vm8, %v371_v0, 0  ;;  %v319_v53 = vadd.s32 536870912, %v318_v37 }
  0xe2   :  { %v536_v52 = vsub.s32 32, %v535_v39  ;;  %v540_v46 = vsub.s32 4294967266, %v535_v39  ;;  %v375_v7 = vand.u32 31, %v373_v41  ;;  %v1428_v40 = vsel %vm1419_vm9, 0, %v242_v56 }
  0xe3   :  { %v239_v36 = vxor.u32 2147483648, %v238_v9  ;;  %v537_v55 = vshll.u32 %v1378_v50, %v535_v39  ;;  %v1431_v48 = vshrl.u32 %v319_v53, 30  ;;  %v374_v51 = vshrl.u32 %v373_v41, 5 }
  0xe4   :  { %v538_v27 = vshrl.u32 %v520_v47, %v536_v52  ;;  %v541_v20 = vadd.s32 127, %v540_v46  ;;  %v376_v49 = vsub.s32 32, %v375_v7  ;;  %v378_v45 = vshll.u32 %v1176_v61, %v375_v7 }
  0xe5   :  { %v240_v42 = vsel %vm157_vm5, %v239_v36, %v238_v9  ;;  %v321_v12 = vshll.u32 %v1431_v48, 30  ;;  %v381_v13 = vshll.u32 %v1177_v63, %v375_v7  ;;  %v384_v16 = vshll.u32 %v1178_v6, %v375_v7 }
  0xe6   :  { %v539_v5 = vor.u32 %v538_v27, %v537_v55  ;;  %v542_v11 = vshll.u32 %v541_v20, 23  ;;  %v379_v15 = vshrl.u32 %v1177_v63, %v376_v49  ;;  %v382_v50 = vshrl.u32 %v1178_v6, %v376_v49 }
  0xe7   :  { %v385_v18 = vshrl.u32 %v1179_v8, %v376_v49  ;;  %v322_v60 = vsub.s32 %v318_v37, %v321_v12  ;;  %v387_v57 = vshll.u32 %v1179_v8, %v375_v7  ;;  %v388_v30 = vshrl.u32 %v1180_v10, %v376_v49 }
  0xe8   :  { %v543_v19 = vor.u32 4788187, %v542_v11  ;;  %v546_v22 = vcvt.s32.f32 %v539_v5  ;;  %v380_v23 = vor.u32 %v379_v15, %v378_v45  ;;  %v383_v25 = vor.u32 %v382_v50, %v381_v13 }
  0xe9   :  { %v386_v29 = vor.u32 %v385_v18, %v384_v16  ;;  %v324_v31 = vsub.s32 0, %v322_v60  ;;  %v390_v63 = vshll.u32 %v1180_v10, %v375_v7  ;;  %v391_v32 = vshrl.u32 %v1181_v17, %v376_v49 }
  0xea   :  { %v544_v0 = vand.u32 2147483647, %v543_v19  ;;  %v377_v6 = vshrl.u32 %v1176_v61, %v376_v49  ;;  %v389_v33 = vor.u32 %v388_v30, %v387_v57  ;;  %vm393_vm10 = vcmp.lt.s32.totalorder %v374_v51, 1 }
  0xeb   :  { %vm395_vm11 = vcmp.lt.s32.totalorder %v374_v51, 3  ;;  %v1054_v37 = vmin.u32 %v324_v31, %v322_v60  ;;  %v392_v56 = vor.u32 %v391_v32, %v390_v63  ;;  %vm396_vm12 = vcmp.lt.s32.totalorder %v374_v51, 4 }
  0xec   :  { %v547_v35 = vmul.f32 %v546_v22, %v544_v0  ;;  %v397_v8 = vsel %vm393_vm10, %v377_v6, %v380_v23  ;;  %v398_v9 = vsel %vm396_vm12, %v386_v29, 2102212464  ;;  %v401_v39 = vsel %vm393_vm10, %v380_v23, %v383_v25 }
  0xed   :  { %v402_v41 = vsel %vm396_vm12, %v389_v33, 920167782  ;;  %v326_v47 = vclz %v1054_v37  ;;  %vm394_vm13 = vcmp.lt.s32.totalorder %v374_v51, 2  ;;  %v399_v52 = vsel %vm395_vm11, %v383_v25, %v398_v9 }
  0xee   :  { %v403_v10 = vsel %vm395_vm11, %v386_v29, %v402_v41  ;;  %v405_v46 = vsel %vm393_vm10, %v383_v25, %v386_v29  ;;  %v406_v61 = vsel %vm396_vm12, %v392_v56, 1326507024  ;;  %v409_v53 = vshll.u32 %v369_v62, 8 }
  0xef   :  { %v404_v17 = vsel %vm394_vm13, %v401_v39, %v403_v10  ;;  %v548_v36 = vxor.u32 2147483648, %v547_v35  ;;  %v1055_v7 = vadd.s32 4294967294, %v326_v47  ;;  %v400_v55 = vsel %vm394_vm13, %v397_v8, %v399_v52 }
  0xf0   :  { %v407_v27 = vsel %vm395_vm11, %v389_v33, %v406_v61  ;;  %v1450_v49 = vmul.u32.u64.low %v409_v53, %v404_v17  ;;  %v1451_v45 = vmul.u32.u64.high %v409_v53, %v404_v17, %v1450_v49  ;;  %v243_v5 = vsel %vm1419_vm9, %v1243_v24, %v240_v42 }
  0xf1   :  { %v408_v20 = vsel %vm394_vm13, %v405_v46, %v407_v27  ;;  %vm1056_vm14 = vcmp.lt.s32.totalorder %v1055_v7, 0  ;;  %1126 = vcosq.f32 %v243_v5  ;;  %v146_v13 = vand.u32 7, %v1404_v26 }
  0xf2   :  { %v1457_v11 = vmul.u32.u64.low %v409_v53, %v408_v20  ;;  %v1458_v12 = vmul.u32.u64.high %v409_v53, %v408_v20, %v1457_v11  ;;  %v329_v62 = vsel %vm1056_vm14, 0, %v1055_v7  ;;  %1128 = vsinq.f32 %v243_v5 }
  0xf3   :  { %vm466_vm15 = vcmp.lt.s32.totalorder %v1253_v34, 0  ;;  %v314_v51 = vadd.s32 %v1387_v59, %v1396_v14  ;;  %v330_v15 = vsub.s32 32, %v329_v62  ;;  %v334_v50 = vsub.s32 4294967266, %v329_v62 }
  0xf4   :  { %v549_v43 = vsel %vm466_vm15, %v548_v36, %v547_v35  ;;  %v416_v42 = vmul.u32 %v409_v53, %v400_v55  ;;  %v419_v16 = vadd.s32 1, %v1451_v45  ;;  %v660_v18 = vadd.s32 3, %v1428_v40 }
  0xf5   :  { %v331_v19 = vshll.u32 %v322_v60, %v329_v62  ;;  %v332_v22 = vshrl.u32 %v314_v51, %v330_v15  ;;  %v335_v57 = vadd.s32 127, %v334_v50  ;;  %vm418_vm0 = vc.u32 %v1458_v12, %v1450_v49 }
  0xf6   :  { %v420_v26 = vsel %vm418_vm0, %v419_v16, %v1451_v45  ;;  %v248_v59 = vand.u32 3, %v1428_v40  ;;  %vm1474_vm1 = vcmp.le.f32.partialorder %v464_v38, 0.7853982  ;;  %vm1478_vm2 = vcmp.lt.s32.totalorder %v146_v13, 4 }
  0xf7   :  { %v333_v14 = vor.u32 %v332_v22, %v331_v19  ;;  %v336_v23 = vshll.u32 %v335_v57, 23  ;;  %v421_v25 = vadd.s32 %v420_v26, %v416_v42  ;;  %v661_v30 = vand.u32 3, %v660_v18 }
  0xf8   :  { %v344_v0 = vsub.s32 4, %v1431_v48  ;;  %v552_v40 = vsel %vm1474_vm1, %v1253_v34, %v549_v43  ;;  %vm260_vm3 = vcmp.lt.s32.totalorder %v1261_v44, 0  ;;  %vm1489_vm4 = vcmp.le.f32.partialorder %v258_v58, 0.7853982 }
  0xf9   :  { %v337_v31 = vor.u32 4788187, %v336_v23  ;;  %v422_v63 = vadd.s32 536870912, %v421_v25  ;;  %vm249_vm5 = vcmp.lt.s32.totalorder %v248_v59, 2  ;;  %vm250_vm6 = vcmp.eq.s32.totalorder %v248_v59, 0 }
  0xfa   :  { %vm253_vm7 = vcmp.eq.s32.totalorder %v248_v59, 2  ;;  %v550_v32 = vsub.s32 4, %v1368_v28  ;;  %v340_v35 = vcvt.s32.f32 %v333_v14  ;;  %1130 = vsinq.f32 %v552_v40 }
  0xfb   :  { %v1127_v6 = vpop.eup %1126  ;;  %v338_v33 = vand.u32 2147483647, %v337_v31  ;;  %v1494_v37 = vshrl.u32 %v422_v63, 30  ;;  %vm662_vm8 = vcmp.lt.s32.totalorder %v661_v30, 2  ;;  %vm666_vm9 = vcmp.eq.s32.totalorder %v661_v30, 2 }
  0xfc   :  { %v1129_v56 = vpop.eup %1128  ;;  %v254_v8 = vxor.u32 2147483648, %v1127_v6  ;;  %v345_v58 = vsel %vm260_vm3, %v344_v0, %v1431_v48  ;;  %1132 = vcosq.f32 %v552_v40  ;;  %vm663_vm10 = vcmp.eq.s32.totalorder %v661_v30, 0 }
  0xfd   :  { %v341_v9 = vmul.f32 %v340_v35, %v338_v33  ;;  %v424_v39 = vshll.u32 %v1494_v37, 30  ;;  %v251_v41 = vxor.u32 2147483648, %v1129_v56  ;;  %v551_v10 = vsel %vm466_vm15, %v550_v32, %v1368_v28 }
  0xfe   :  { %v255_v47 = vsel %vm253_vm7, %v254_v8, %v1129_v56  ;;  %v668_v52 = vsel %vm666_vm9, %v254_v8, %v1129_v56  ;;  %vm247_vm11 = vweird.f32 %v1243_v24  ;;  %v347_v7 = vsel %vm1489_vm4, 0, %v345_v58 }
  0xff   :  { %v342_v17 = vxor.u32 2147483648, %v341_v9  ;;  %v425_v46 = vsub.s32 %v421_v25, %v424_v39  ;;  %v252_v61 = vsel %vm250_vm6, %v1127_v6, %v251_v41  ;;  %v665_v53 = vsel %vm663_vm10, %v1127_v6, %v251_v41 }
 0x100   :  { %v256_v48 = vsel %vm249_vm5, %v252_v61, %v255_v47  ;;  %v669_v36 = vsel %vm662_vm8, %v665_v53, %v668_v52  ;;  %v553_v5 = vsel %vm1474_vm1, 0, %v551_v10  ;;  %v764_v62 = vadd.s32 3, %v347_v7 }
 0x101   :  { %v343_v55 = vsel %vm260_vm3, %v342_v17, %v341_v9  ;;  %v427_v27 = vsub.s32 0, %v425_v46  ;;  %v257_v20 = vsel %vm247_vm11, nan, %v256_v48  ;;  %v670_v28 = vsel %vm247_vm11, nan, %v669_v36 }
 0x102   :  { %v985_v45 = vsel %vm1478_vm2, %v257_v20, %v670_v28  ;;  %v346_v24 = vsel %vm1489_vm4, %v1261_v44, %v343_v55  ;;  %v972_v15 = vadd.s32 3, %v553_v5  ;;  %v351_v50 = vand.u32 3, %v347_v7 }
 0x103   :  { %v1058_v11 = vmin.u32 %v427_v27, %v425_v46  ;;  %998 = vrot.lane.b32.xlu1 %v985_v45, %s1182_s1  ;;  %1134 = vcosq.f32 %v346_v24  ;;  %v557_v16 = vand.u32 3, %v553_v5  ;;  %v765_v18 = vand.u32 3, %v764_v62 }
 0x104   :  { %1136 = vsinq.f32 %v346_v24  ;;  %v1131_v13 = vpop.eup %1130  ;;  %v417_v22 = vadd.s32 %v1450_v49, %v1458_v12  ;;  %v973_v57 = vand.u32 3, %v972_v15  ;;  %vm989_vm13 = vcmask 31744  }
 0x105   :  { %v429_v51 = vclz %v1058_v11  ;;  %v560_v19 = vxor.u32 2147483648, %v1131_v13  ;;  %vm350_vm14 = vweird.f32 %v1261_v44  ;;  %vm352_vm15 = vcmp.lt.s32.totalorder %v351_v50, 2  ;;  %990 = vst.msk [vmem:[#allocation2] sm:$0xff] %vm989_vm13, %v1212_v2  ;;  %991 = vst.msk [vmem:[#allocation2 + $0x8] sm:$0xff] %vm989_vm13, %v1218_v4 }
 0x106   :  { %v1133_v43 = vpop.eup %1132  ;;  %vm353_vm0 = vcmp.eq.s32.totalorder %v351_v50, 0  ;;  %992 = vst.msk [vmem:[#allocation2 + $0x10] sm:$0xff] %vm989_vm13, %v1210_v1  ;;  %993 = vst.msk [vmem:[#allocation2 + $0x18] sm:$0xff] %vm989_vm13, %v1216_v3  ;;  %vm356_vm1 = vcmp.eq.s32.totalorder %v351_v50, 2  ;;  %vm559_vm3 = vcmp.eq.s32.totalorder %v557_v16, 0  ;;  %vm766_vm4 = vcmp.lt.s32.totalorder %v765_v18, 2 }
 0x107   :  { %v1059_v42 = vadd.s32 4294967294, %v429_v51  ;;  %v563_v59 = vxor.u32 2147483648, %v1133_v43  ;;  %vm770_vm5 = vcmp.eq.s32.totalorder %v765_v18, 2  ;;  %v561_v49 = vsel %vm559_vm3, %v1133_v43, %v560_v19 }
 0x108   :  { %vm562_vm6 = vcmp.eq.s32.totalorder %v557_v16, 2  ;;  %vm975_vm7 = vcmp.eq.s32.totalorder %v973_v57, 0  ;;  %vm978_vm8 = vcmp.eq.s32.totalorder %v973_v57, 2  ;;  %vm767_vm9 = vcmp.eq.s32.totalorder %v765_v18, 0 }
 0x109   :  { %vm1060_vm12 = vcmp.lt.s32.totalorder %v1059_v42, 0  ;;  %v564_v4 = vsel %vm562_vm6, %v563_v59, %v1131_v13  ;;  %v977_v40 = vsel %vm975_vm7, %v1133_v43, %v560_v19  ;;  %v980_v63 = vsel %vm978_vm8, %v563_v59, %v1131_v13 }
 0x10a   :  { %v432_v26 = vsel %vm1060_vm12, 0, %v1059_v42  ;;  %vm558_vm10 = vcmp.lt.s32.totalorder %v557_v16, 2  ;;  %vm974_vm11 = vcmp.lt.s32.totalorder %v973_v57, 2  ;;  %vm556_vm12 = vweird.f32 %v1253_v34 }
 0x10b   :  { %v433_v14 = vsub.s32 32, %v432_v26  ;;  %v437_v23 = vsub.s32 4294967266, %v432_v26  ;;  %v434_v25 = vshll.u32 %v425_v46, %v432_v26  ;;  %v565_v58 = vsel %vm558_vm10, %v561_v49, %v564_v4 }
 0x10c   :  { %v981_v9 = vsel %vm974_vm11, %v977_v40, %v980_v63  ;;  %v447_v46 = vsub.s32 4, %v1494_v37  ;;  %v566_v61 = vsel %vm556_vm12, nan, %v565_v58  ;;  %vm363_vm13 = vcmp.lt.s32.totalorder %v1344_v54, 0 }
 0x10d   :  { %v1135_v12 = vpop.eup %1134  ;;  %v435_v29 = vshrl.u32 %v417_v22, %v433_v14  ;;  %v438_v30 = vadd.s32 127, %v437_v23  ;;  %v982_v53 = vsel %vm556_vm12, nan, %v981_v9  ;;  %vm453_vm6 = vweird.f32 %v1344_v54 }
 0x10e   :  { %v1137_v2 = vpop.eup %1136  ;;  %v357_v0 = vxor.u32 2147483648, %v1135_v12  ;;  %v988_v36 = vsel %vm1478_vm2, %v566_v61, %v982_v53  ;;  %v448_v7 = vsel %vm363_vm13, %v447_v46, %v1494_v37  ;;  %vm1010_vm7 = vcmask 293920  }
 0x10f   :  { %v436_v1 = vor.u32 %v435_v29, %v434_v25  ;;  %v439_v3 = vshll.u32 %v438_v30, 23  ;;  %v354_v31 = vxor.u32 2147483648, %v1137_v2 }
 0x110   :  { %v358_v38 = vsel %vm356_vm1, %v357_v0, %v1137_v2  ;;  %v772_v32 = vsel %vm770_vm5, %v357_v0, %v1137_v2 }
 0x111   :  { %v440_v6 = vor.u32 4788187, %v439_v3  ;;  %v355_v33 = vsel %vm353_vm0, %v1135_v12, %v354_v31  ;;  %v769_v35 = vsel %vm767_vm9, %v1135_v12, %v354_v31  ;;  %v443_v41 = vcvt.s32.f32 %v436_v1 }
 0x112   :  { %v359_v56 = vsel %vm352_vm15, %v355_v33, %v358_v38  ;;  %v773_v8 = vsel %vm766_vm4, %v769_v35, %v772_v32 }
 0x113   :  { %v441_v39 = vand.u32 2147483647, %v440_v6  ;;  %v360_v47 = vsel %vm350_vm14, nan, %v359_v56  ;;  %v774_v52 = vsel %vm350_vm14, nan, %v773_v8  ;;  %vm362_vm14 = vcmp.le.f32.partialorder %v361_v21, 0.7853982 }
 0x114   :  { %v986_v10 = vsel %vm1478_vm2, %v360_v47, %v774_v52  ;;  %v450_v55 = vsel %vm362_vm14, 0, %v448_v7 }
 0x115   :  { %v444_v17 = vmul.f32 %v443_v41, %v441_v39  ;;  %1000 = vrot.lane.b32.xlu0 %v986_v10, %s1182_s1  ;;  %v868_v27 = vadd.s32 3, %v450_v55  ;;  %v454_v20 = vand.u32 3, %v450_v55 }
 0x117   :  { %v445_v48 = vxor.u32 2147483648, %v444_v17  ;;  %v869_v28 = vand.u32 3, %v868_v27  ;;  %vm459_vm15 = vcmp.eq.s32.totalorder %v454_v20, 2  ;;  %vm456_vm1 = vcmp.eq.s32.totalorder %v454_v20, 0 }
 0x118   :  { %vm455_vm4 = vcmp.lt.s32.totalorder %v454_v20, 2 }
 0x119   :  { %v446_v44 = vsel %vm363_vm13, %v445_v48, %v444_v17  ;;  %1004 = vrot.lane.b32.xlu0 %v988_v36, %s1182_s1  ;;  %vm874_vm0 = vcmp.eq.s32.totalorder %v869_v28, 2  ;;  %vm871_vm3 = vcmp.eq.s32.totalorder %v869_v28, 0  ;;  %vm870_vm5 = vcmp.lt.s32.totalorder %v869_v28, 2 }
 0x11a   :  { %v449_v34 = vsel %vm362_vm14, %v1344_v54, %v446_v44 }
 0x11b   :  { %1138 = vcosq.f32 %v449_v34 }
 0x11c   :  { %1140 = vsinq.f32 %v449_v34 }
 0x125   :  { %v1139_v45 = vpop.eup %1138 }
 0x126   :  { %v1141_v24 = vpop.eup %1140  ;;  %v460_v5 = vxor.u32 2147483648, %v1139_v45 }
 0x127   :  { %v457_v11 = vxor.u32 2147483648, %v1141_v24 }
 0x128   :  { %v461_v21 = vsel %vm459_vm15, %v460_v5, %v1141_v24  ;;  %v876_v37 = vsel %vm874_vm0, %v460_v5, %v1141_v24 }
 0x129   :  { %v458_v62 = vsel %vm456_vm1, %v1139_v45, %v457_v11  ;;  %v873_v13 = vsel %vm871_vm3, %v1139_v45, %v457_v11 }
 0x12a   :  { %v462_v51 = vsel %vm455_vm4, %v458_v62, %v461_v21  ;;  %v877_v15 = vsel %vm870_vm5, %v873_v13, %v876_v37 }
 0x12b   :  { %v463_v50 = vsel %vm453_vm6, nan, %v462_v51  ;;  %v878_v43 = vsel %vm453_vm6, nan, %v877_v15 }
 0x12c   :  { %v987_v42 = vsel %vm1478_vm2, %v463_v50, %v878_v43 }
 0x12d   :  { %1002 = vrot.lane.b32.xlu1 %v987_v42, %s1182_s1 }
 0x175   :  { %v999_v16 = vpop.permute.xlu1 %998 }
 0x176   :  { %1011 = vst.msk [vmem:[#allocation2] sm:$0xff] %vm1010_vm7, %v999_v16 }
 0x187   :  { %v1001_v18 = vpop.permute.xlu0 %1000 }
 0x188   :  { %1012 = vst.msk [vmem:[#allocation2 + $0x8] sm:$0xff] %vm1010_vm7, %v1001_v18 }
 0x18b   :  { %v1005_v19 = vpop.permute.xlu0 %1004 }
 0x18c   :  { %1014 = vst.msk [vmem:[#allocation2 + $0x18] sm:$0xff] %vm1010_vm7, %v1005_v19 }
 0x19f   :  { %v1003_v22 = vpop.permute.xlu1 %1002 }
 0x1a0   :  { %1013 = vst.msk [vmem:[#allocation2 + $0x10] sm:$0xff] %vm1010_vm7, %v1003_v22 }
 0x1a1   :  { %1022 = vsyncadd [#allocation3], %s1021_s13  ;;  %p1083_p1 = scmp.ne.s32.totalorder %s1204_s12, 0  ;;  %s1087_s19 = sshll.u32 %s1201_s9, 9 }
 0x1a2   :  { %s1560_s22 = scalar_lea.hbm %s1592_s2, %s1087_s19  ;;  %s1183_s23 = smov [#allocation2]  }
 0x1a3   :  { %s1027_s24 = sshll.u32 %s1183_s23, 4  ;;  %s1562_s24 = int_to_ptr.vmem [resolvable:$true] %s1027_s24 }
 0x1a4   :  { %s1142_s25 = scalar_lea.vmem %s1562_s24, %s1204_s12  ;;  %s1148_s26 = scalar_lea.vmem %s1562_s24, 512 }
 0x1a5   :  { %p1143_p2 = scmp.ne.s32.totalorder %s1562_s24, %s1142_s25  ;;  %p1149_p5 = scmp.lt.s32.totalorder %s1562_s24, %s1562_s24 }
 0x1a6   :  { %p1150_p6 = scmp.lt.s32.totalorder %s1148_s26, %s1142_s25 }
 0x1a7   :  { %p1144_p3 = pnand %p1143_p2, %p1083_p1 }
 0x1a8   :  { %p1151_p7 = por %p1150_p6, %p1149_p5 }
 0x1a9   :  { %p1145_p4 = pneg %p1144_p3 }
 0x1ab   :  { %p1152_p8 = pnand %p1151_p7, %p1145_p4 }
 0x1ad   :  { %1155 = shalt.err (!%p1152_p8)
}
 0x1ae   :  { %s1156_s27 = scalar_lea.hbm %s1560_s22, %s1204_s12  ;;  %s1160_s30 = scalar_lea.hbm %s1592_s2, 384 }
 0x1af   :  { %p1157_p9 = scmp.ne.s32.totalorder %s1560_s22, %s1156_s27  ;;  %p1161_p12 = scmp.lt.u32.totalorder %s1560_s22, %s1592_s2 }
 0x1b0   :  { %p1162_p13 = scmp.lt.u32.totalorder %s1160_s30, %s1156_s27  ;;  %p1164_p2 = scmp.lt.u32.totalorder %s1156_s27, %s1560_s22 }
 0x1b1   :  { %p1158_p10 = pnand %p1157_p9, %p1083_p1 }
 0x1b2   :  { %p1163_p0 = por %p1162_p13, %p1161_p12 }
 0x1b3   :  { %p1159_p11 = pneg %p1158_p10 }
 0x1b4   :  { %p1165_p3 = por %p1164_p2, %p1163_p0 }
 0x1b6   :  { %p1166_p4 = pnand %p1165_p3, %p1159_p11 }
 0x1b8   :  { %1169 = shalt.err (!%p1166_p4)
}
 0x1b9   :  { %s1184_s5 = smov 128   ;;  %s1185_s6 = smov 8  }
 0x1ba   :  { %1033 = dma.vmem_to_hbm [thread:$0]  (%p1083_p1), %s1562_s24, %s1204_s12, %s1560_s22, [#allocation3], %s1184_s5, %s1184_s5, %s1185_s6  }
 0x1bb   :  { %1170 = dma.done.wait [#allocation3], 512  }
 0x1bc   :  { %1171 = vsyncadd [#allocation3], 4294966784 }
 0x1bd   :  { %1037 = vsyncpa [#allocation3], 1 }

</bundles_post_ra>
